<compile_context>
chip_gen: v5e
topology: v5e:2x2
jax: 0.10.0
libtpu: 0.0.40
codegen_flags: <defaults>
</compile_context>

<pallas_src>
import functools
import math

import jax
import jax.numpy as jnp
import numpy as np
from jax.experimental import pallas as pl
from jax.experimental.pallas import tpu as pltpu

STATE_DIM = 16
ACTION_DIM = 4
HIDDEN = 64
BATCH = 8
ACTION_STD_INIT = 0.6

FUSED = 2 * HIDDEN                 # 128: [actor hidden | critic hidden] lanes (vreg/MXU native)
IN_WIDTH = 32                      # packed input: state (0:16) | action-or-noise (16:20) | pad
OUT_WIDTH = 8                      # narrow contiguous packed output
CONST_ROWS = 8                     # f32 constants/biases block rows

# bf16 weight-slab row offsets -- all multiples of 16 (bf16 sublane tile) => zero-cost slices.
_W1_OFF = 0                        # (16, 128)  [actor W1 | critic W1]
_W2_OFF = _W1_OFF + STATE_DIM      # (128,128)  block-diag [[actor W2, 0], [0, critic W2]]
_W3_OFF = _W2_OFF + FUSED          # (128,128)  heads: mean -> lanes 0:4, value -> lane 4
W_ROWS = _W3_OFF + FUSED           # 272 rows x 128 lanes bf16 (~68 KiB)

_SINGLE_BLOCK_MAX = 512            # rollout-sized batches: one block, grid=1
_BATCH_TILE = 1024                 # PPO-update batches: big tiles, grid >= 2 ("parallel")


def _round_up(n, m):
    return ((n + m - 1) // m) * m


# ---------------------------------------------------------------------------
# Kernel
# ---------------------------------------------------------------------------
def _actor_critic_kernel(sample_mode, xin_ref, consts_ref, w_ref, out_ref):
    x = xin_ref[:, 0:STATE_DIM]                                      # (TM,16) f32 state
    av = xin_ref[:, STATE_DIM:STATE_DIM + ACTION_DIM]                # (TM,4)  noise (act) / action (eval)

    # Grid-invariant f32 constants: dist constants + the three fused biases.
    sqrt_var = consts_ref[0:1, 0:ACTION_DIM]                         # (1,4)
    inv_var = consts_ref[0:1, ACTION_DIM:2 * ACTION_DIM]             # (1,4)
    lp_const = consts_ref[0:1, 2 * ACTION_DIM:2 * ACTION_DIM + 1]    # (1,1) = -0.5*(A*log2pi+logdet)
    b1 = consts_ref[1:2, :]                                          # (1,128)
    b2 = consts_ref[2:3, :]
    b3 = consts_ref[3:4, :]

    # bf16 weight slab views (16-row aligned => no relayout).
    w1 = w_ref[_W1_OFF:_W1_OFF + STATE_DIM, :]                       # (16,128)  bf16
    w2 = w_ref[_W2_OFF:_W2_OFF + FUSED, :]                           # (128,128) bf16 block-diag
    w3 = w_ref[_W3_OFF:_W3_OFF + FUSED, :]                           # (128,128) bf16 fused heads

    # Fused actor+critic MLP: lanes 0:64 actor path, 64:128 critic path.
    # bf16 MXU operands, f32 accumulation; tanh and everything downstream in f32.
    h = jnp.tanh(jnp.dot(x.astype(jnp.bfloat16), w1,
                         preferred_element_type=jnp.float32) + b1)   # (TM,128)
    h = jnp.tanh(jnp.dot(h.astype(jnp.bfloat16), w2,
                         preferred_element_type=jnp.float32) + b2)   # (TM,128)
    o = jnp.dot(h.astype(jnp.bfloat16), w3,
                preferred_element_type=jnp.float32) + b3             # (TM,128)

    mean = jnp.maximum(o[:, 0:ACTION_DIM], 0.0)    # actor head ends in nn.ReLU() (per spec)
    value = o[:, ACTION_DIM:ACTION_DIM + 1]        # critic head

    tm = x.shape[0]
    if sample_mode:
        # act(): action = mean + sqrt(var)*noise; (action-mean)^2/var == noise^2 exactly.
        action = mean + sqrt_var * av
        maha = jnp.sum(av * av, axis=-1, keepdims=True)              # (TM,1)
        logprob = -0.5 * maha + lp_const
        packed = jnp.concatenate(
            [action, logprob, value,
             jnp.zeros((tm, OUT_WIDTH - ACTION_DIM - 2), jnp.float32)], axis=-1)
    else:
        # evaluate(): action is given.
        diff = av - mean
        maha = jnp.sum(diff * diff * inv_var, axis=-1, keepdims=True)
        logprob = -0.5 * maha + lp_const
        packed = jnp.concatenate(
            [logprob, value,
             jnp.zeros((tm, OUT_WIDTH - 2), jnp.float32)], axis=-1)

    # Single full-width store -> one narrow, fully contiguous writeback DMA.
    out_ref[...] = packed


def _pallas_forward(sample_mode, weight_slab, consts, state, act_or_noise):
    batch = state.shape[0]
    pad_lanes = IN_WIDTH - STATE_DIM - ACTION_DIM
    xin = jnp.concatenate(
        [state.astype(jnp.float32), act_or_noise.astype(jnp.float32),
         jnp.zeros((batch, pad_lanes), jnp.float32)], axis=1)        # one merged input

    if batch <= _SINGLE_BLOCK_MAX:
        tm, b_pad = batch, batch                                     # single block, grid=1
    else:
        # Large batches: tiles up to _BATCH_TILE rows, but always >= 2 grid steps so the
        # "parallel" axis can shard across both v7x TensorCores.
        tm = min(_BATCH_TILE, _round_up(-(-batch // 2), 8))
        b_pad = _round_up(batch, tm)
        if b_pad != batch:
            xin = jnp.pad(xin, ((0, b_pad - batch), (0, 0)))
    grid = b_pad // tm

    out = pl.pallas_call(
        functools.partial(_actor_critic_kernel, sample_mode),
        out_shape=jax.ShapeDtypeStruct((b_pad, OUT_WIDTH), jnp.float32),
        grid_spec=pltpu.PrefetchScalarGridSpec(
            num_scalar_prefetch=0,
            grid=(grid,),
            in_specs=[
                pl.BlockSpec((tm, IN_WIDTH), lambda i: (i, 0)),       # packed state|action
                pl.BlockSpec((CONST_ROWS, FUSED), lambda i: (0, 0)),  # f32 consts + biases
                pl.BlockSpec((W_ROWS, FUSED), lambda i: (0, 0)),      # bf16 weight slab
            ],
            out_specs=pl.BlockSpec((tm, OUT_WIDTH), lambda i: (i, 0)),
        ),
        compiler_params=pltpu.CompilerParams(
            dimension_semantics=("parallel",)),
    )(xin, consts, weight_slab)

    return out[:batch] if b_pad != batch else out


# ---------------------------------------------------------------------------
# Host-side init / packing
# ---------------------------------------------------------------------------
def init_params(key):
    """Deterministic init mirroring the PyTorch module's __init__."""
    ks = jax.random.split(key, 6)

    def linear(k, fan_in, fan_out):
        kw, kb = jax.random.split(k)
        bound = 1.0 / math.sqrt(fan_in)
        w = jax.random.uniform(kw, (fan_in, fan_out), jnp.float32, -bound, bound)
        b = jax.random.uniform(kb, (1, fan_out), jnp.float32, -bound, bound)
        return w, b

    aw1, ab1 = linear(ks[0], STATE_DIM, HIDDEN)
    aw2, ab2 = linear(ks[1], HIDDEN, HIDDEN)
    # nn.init.normal_(actor[-2].weight, std=0.01); nn.init.constant_(actor[-2].bias, 1.0)
    aw3 = 0.01 * jax.random.normal(ks[2], (HIDDEN, ACTION_DIM), jnp.float32)
    ab3 = jnp.ones((1, ACTION_DIM), jnp.float32)
    cw1, cb1 = linear(ks[3], STATE_DIM, HIDDEN)
    cw2, cb2 = linear(ks[4], HIDDEN, HIDDEN)
    cw3, cb3 = linear(ks[5], HIDDEN, 1)
    return (aw1, ab1, aw2, ab2, aw3, ab3, cw1, cb1, cw2, cb2, cw3, cb3)


def pack_weights(params):
    """Fuse actor+critic weights into one bf16 (272, 128) slab (16-row-aligned segments)."""
    aw1, _, aw2, _, aw3, _, cw1, _, cw2, _, cw3, _ = params
    w1 = jnp.concatenate([aw1, cw1], axis=1)                        # (16, 128)
    z = jnp.zeros((HIDDEN, HIDDEN), jnp.float32)
    w2 = jnp.block([[aw2, z], [z, cw2]])                            # (128, 128) block-diag
    w3 = jnp.zeros((FUSED, FUSED), jnp.float32)
    w3 = w3.at[:HIDDEN, :ACTION_DIM].set(aw3)                       # actor hidden -> mean
    w3 = w3.at[HIDDEN:, ACTION_DIM:ACTION_DIM + 1].set(cw3)         # critic hidden -> value
    slab = jnp.concatenate([w1, w2, w3], axis=0)
    assert slab.shape == (W_ROWS, FUSED)
    return slab.astype(jnp.bfloat16)


def pack_consts(params, action_var):
    """f32 constants block: dist constants (row 0) + fused biases (rows 1..3)."""
    (_, ab1, _, ab2, _, ab3, _, cb1, _, cb2, _, cb3) = params
    var = jnp.reshape(action_var, (ACTION_DIM,)).astype(jnp.float32)
    lp_const = -0.5 * (ACTION_DIM * math.log(2.0 * math.pi) + jnp.sum(jnp.log(var)))
    c = jnp.zeros((CONST_ROWS, FUSED), jnp.float32)
    c = c.at[0, 0:ACTION_DIM].set(jnp.sqrt(var))
    c = c.at[0, ACTION_DIM:2 * ACTION_DIM].set(1.0 / var)
    c = c.at[0, 2 * ACTION_DIM].set(lp_const)
    c = c.at[1, :].set(jnp.concatenate([ab1, cb1], axis=1)[0])
    c = c.at[2, :].set(jnp.concatenate([ab2, cb2], axis=1)[0])
    b3 = jnp.zeros((FUSED,), jnp.float32)
    b3 = b3.at[:ACTION_DIM].set(ab3[0])
    b3 = b3.at[ACTION_DIM].set(cb3[0, 0])
    c = c.at[3, :].set(b3)
    return c


# ---------------------------------------------------------------------------
# Public wrappers mirroring ActorCritic.act / .evaluate
# ---------------------------------------------------------------------------
def act(weight_slab, consts, state, key):
    """Returns (action, action_logprob, state_val)."""
    noise = jax.random.normal(key, (state.shape[0], ACTION_DIM), jnp.float32)
    out = _pallas_forward(True, weight_slab, consts, state, noise)
    action = out[:, 0:ACTION_DIM]
    logprob = out[:, ACTION_DIM]
    value = out[:, ACTION_DIM + 1:ACTION_DIM + 2]
    return action, logprob, value


def evaluate(weight_slab, consts, action_var, state, action):
    """Returns (logprobs, state_values, dist_entropy)."""
    out = _pallas_forward(False, weight_slab, consts, state, action)
    logprob = out[:, 0]
    value = out[:, 1:2]
    # Entropy of a fixed diagonal Gaussian is a per-call constant -> wrapper.
    log2pi = math.log(2.0 * math.pi)
    logdet = jnp.sum(jnp.log(jnp.reshape(action_var, (-1,)).astype(jnp.float32)))
    entropy = jnp.full((state.shape[0],),
                       0.5 * ACTION_DIM * (1.0 + log2pi), jnp.float32) + 0.5 * logdet
    return logprob, value, entropy


# ---------------------------------------------------------------------------
# Pure-JAX f32 reference
# ---------------------------------------------------------------------------
def _mlp_ref(x, w1, b1, w2, b2, w3, b3):
    h = jnp.tanh(jnp.dot(x, w1, preferred_element_type=jnp.float32) + b1)
    h = jnp.tanh(jnp.dot(h, w2, preferred_element_type=jnp.float32) + b2)
    return jnp.dot(h, w3, preferred_element_type=jnp.float32) + b3


def _reference_evaluate(params, action_var, state, action):
    (aw1, ab1, aw2, ab2, aw3, ab3, cw1, cb1, cw2, cb2, cw3, cb3) = params
    mean = jnp.maximum(_mlp_ref(state, aw1, ab1, aw2, ab2, aw3, ab3), 0.0)
    value = _mlp_ref(state, cw1, cb1, cw2, cb2, cw3, cb3)
    var = jnp.reshape(action_var, (ACTION_DIM,)).astype(jnp.float32)
    log2pi = math.log(2.0 * math.pi)
    logdet = jnp.sum(jnp.log(var))
    maha = jnp.sum((action - mean) ** 2 / var, axis=-1)
    logprob = -0.5 * (maha + ACTION_DIM * log2pi + logdet)
    entropy = jnp.full((state.shape[0],),
                       0.5 * ACTION_DIM * (1.0 + log2pi)) + 0.5 * logdet
    return logprob, value, entropy


if __name__ == "__main__":
    key = jax.random.PRNGKey(0)
    k_param, k_state, k_sample, k_state2, k_act2 = jax.random.split(key, 5)

    raw_params = init_params(k_param)
    weight_slab = pack_weights(raw_params)
    action_var = jnp.full((ACTION_DIM,), ACTION_STD_INIT * ACTION_STD_INIT, jnp.float32)
    consts = pack_consts(raw_params, action_var)

    state = jax.random.normal(k_state, (BATCH, STATE_DIM), jnp.float32)

    # act(state)  -- rollout path (single block, grid=1)
    action, act_logprob, state_val = act(weight_slab, consts, state, k_sample)
    jax.block_until_ready((action, act_logprob, state_val))

    # evaluate(state, action)
    logprobs, state_values, dist_entropy = evaluate(
        weight_slab, consts, action_var, state, action)
    jax.block_until_ready((logprobs, state_values, dist_entropy))

    # Correctness vs pure-JAX f32 reference (tolerances reflect bf16 MXU operands).
    RTOL, ATOL = 2e-2, 5e-2
    ref_lp, ref_v, ref_ent = _reference_evaluate(raw_params, action_var, state, action)
    np.testing.assert_allclose(np.asarray(logprobs), np.asarray(ref_lp), rtol=RTOL, atol=ATOL)
    np.testing.assert_allclose(np.asarray(state_values), np.asarray(ref_v), rtol=RTOL, atol=ATOL)
    np.testing.assert_allclose(np.asarray(dist_entropy), np.asarray(ref_ent), rtol=1e-5, atol=1e-5)
    np.testing.assert_allclose(np.asarray(act_logprob), np.asarray(ref_lp), rtol=RTOL, atol=ATOL)

    # Exercise the PPO-update path: grid >= 2 ("parallel"), big tiles, batch padding.
    big_b = 1500   # -> tm=752, b_pad=1504, grid=2
    big_state = jax.random.normal(k_state2, (big_b, STATE_DIM), jnp.float32)
    big_action = jax.random.normal(k_act2, (big_b, ACTION_DIM), jnp.float32)
    blp, bval, bent = evaluate(weight_slab, consts, action_var, big_state, big_action)
    jax.block_until_ready((blp, bval, bent))
    rlp, rv, _ = _reference_evaluate(raw_params, action_var, big_state, big_action)
    np.testing.assert_allclose(np.asarray(blp), np.asarray(rlp), rtol=RTOL, atol=ATOL)
    np.testing.assert_allclose(np.asarray(bval), np.asarray(rv), rtol=RTOL, atol=ATOL)

    print("KERNEL_OK")
</pallas_src>

<mosaic_0001>
module attributes {stable_mosaic.version = 11 : i64} {
  func.func @_actor_critic_kernel(%arg0: i32, %arg1: memref<8x32xf32, #tpu.memory_space<vmem>>, %arg2: memref<8x128xf32, #tpu.memory_space<vmem>>, %arg3: memref<272x128xbf16, #tpu.memory_space<vmem>>, %arg4: memref<8x8xf32, #tpu.memory_space<vmem>>) attributes {dimension_semantics = [#tpu.dimension_semantics<parallel>], iteration_bounds = array<i64: 1>, scalar_prefetch = 0 : i64, scratch_operands = 0 : i64, tpu.core_type = #tpu.core_type<tc>, window_params = [{transform_indices = @transform_0, window_bounds = array<i64: 8, 32>}, {pipeline_mode = #tpu.pipeline_mode<synchronous>, transform_indices = @transform_1, window_bounds = array<i64: 8, 128>}, {pipeline_mode = #tpu.pipeline_mode<synchronous>, transform_indices = @transform_2, window_bounds = array<i64: 272, 128>}, {transform_indices = @transform_3, window_bounds = array<i64: 8, 8>}]} {
    %c0 = arith.constant 0 : index
    %c0_0 = arith.constant 0 : index
    %0 = vector.load %arg1[%c0, %c0_0] : memref<8x32xf32, #tpu.memory_space<vmem>>, vector<8x16xf32>
    %c0_1 = arith.constant 0 : index
    %c16 = arith.constant 16 : index
    %1 = vector.load %arg1[%c0_1, %c16] : memref<8x32xf32, #tpu.memory_space<vmem>>, vector<8x4xf32>
    %c0_2 = arith.constant 0 : index
    %c0_3 = arith.constant 0 : index
    %2 = vector.load %arg2[%c0_2, %c0_3] : memref<8x128xf32, #tpu.memory_space<vmem>>, vector<1x4xf32>
    %c0_4 = arith.constant 0 : index
    %c8 = arith.constant 8 : index
    %3 = vector.load %arg2[%c0_4, %c8] : memref<8x128xf32, #tpu.memory_space<vmem>>, vector<1x1xf32>
    %c1 = arith.constant 1 : index
    %c0_5 = arith.constant 0 : index
    %4 = vector.load %arg2[%c1, %c0_5] : memref<8x128xf32, #tpu.memory_space<vmem>>, vector<1x128xf32>
    %c2 = arith.constant 2 : index
    %c0_6 = arith.constant 0 : index
    %5 = vector.load %arg2[%c2, %c0_6] : memref<8x128xf32, #tpu.memory_space<vmem>>, vector<1x128xf32>
    %c3 = arith.constant 3 : index
    %c0_7 = arith.constant 0 : index
    %6 = vector.load %arg2[%c3, %c0_7] : memref<8x128xf32, #tpu.memory_space<vmem>>, vector<1x128xf32>
    %c0_8 = arith.constant 0 : index
    %c0_9 = arith.constant 0 : index
    %7 = vector.load %arg3[%c0_8, %c0_9] : memref<272x128xbf16, #tpu.memory_space<vmem>>, vector<16x128xbf16>
    %c16_10 = arith.constant 16 : index
    %c0_11 = arith.constant 0 : index
    %8 = vector.load %arg3[%c16_10, %c0_11] : memref<272x128xbf16, #tpu.memory_space<vmem>>, vector<128x128xbf16>
    %c144 = arith.constant 144 : index
    %c0_12 = arith.constant 0 : index
    %9 = vector.load %arg3[%c144, %c0_12] : memref<272x128xbf16, #tpu.memory_space<vmem>>, vector<128x128xbf16>
    %10 = arith.truncf %0 : vector<8x16xf32> to vector<8x16xbf16>
    %cst = arith.constant dense<0.000000e+00> : vector<8x128xf32>
    %11 = tpu.matmul %10, %7, %cst {dimension_numbers = #tpu.dot_dimension_numbers<[1], [0], [0], [1], [0, 0, 1, 1], [], []>} : vector<8x16xbf16>, vector<16x128xbf16>, vector<8x128xf32> -> vector<8x128xf32>
    %12 = vector.broadcast %4 : vector<1x128xf32> to vector<8x128xf32>
    %13 = arith.addf %11, %12 : vector<8x128xf32>
    %14 = math.tanh %13 : vector<8x128xf32>
    %15 = arith.truncf %14 : vector<8x128xf32> to vector<8x128xbf16>
    %cst_13 = arith.constant dense<0.000000e+00> : vector<8x128xf32>
    %16 = tpu.matmul %15, %8, %cst_13 {dimension_numbers = #tpu.dot_dimension_numbers<[1], [0], [0], [1], [0, 0, 1, 1], [], []>} : vector<8x128xbf16>, vector<128x128xbf16>, vector<8x128xf32> -> vector<8x128xf32>
    %17 = vector.broadcast %5 : vector<1x128xf32> to vector<8x128xf32>
    %18 = arith.addf %16, %17 : vector<8x128xf32>
    %19 = math.tanh %18 : vector<8x128xf32>
    %20 = arith.truncf %19 : vector<8x128xf32> to vector<8x128xbf16>
    %cst_14 = arith.constant dense<0.000000e+00> : vector<8x128xf32>
    %21 = tpu.matmul %20, %9, %cst_14 {dimension_numbers = #tpu.dot_dimension_numbers<[1], [0], [0], [1], [0, 0, 1, 1], [], []>} : vector<8x128xbf16>, vector<128x128xbf16>, vector<8x128xf32> -> vector<8x128xf32>
    %22 = vector.broadcast %6 : vector<1x128xf32> to vector<8x128xf32>
    %23 = arith.addf %21, %22 : vector<8x128xf32>
    %24 = vector.extract_strided_slice %23 {offsets = [0, 0], sizes = [8, 4], strides = [1, 1]} : vector<8x128xf32> to vector<8x4xf32>
    %cst_15 = arith.constant 0.000000e+00 : f32
    %25 = vector.broadcast %cst_15 : f32 to vector<8x4xf32>
    %26 = arith.maximumf %24, %25 : vector<8x4xf32>
    %27 = vector.extract_strided_slice %23 {offsets = [0, 4], sizes = [8, 1], strides = [1, 1]} : vector<8x128xf32> to vector<8x1xf32>
    %28 = vector.broadcast %2 : vector<1x4xf32> to vector<8x4xf32>
    %29 = arith.mulf %28, %1 : vector<8x4xf32>
    %30 = arith.addf %26, %29 : vector<8x4xf32>
    %31 = arith.mulf %1, %1 : vector<8x4xf32>
    %cst_16 = arith.constant dense<0.000000e+00> : vector<8xf32>
    %32 = vector.multi_reduction <add>, %31, %cst_16 [1] : vector<8x4xf32> to vector<8xf32>
    %33 = vector.shape_cast %32 : vector<8xf32> to vector<8x1xf32>
    %cst_17 = arith.constant -5.000000e-01 : f32
    %34 = vector.broadcast %cst_17 : f32 to vector<8x1xf32>
    %35 = arith.mulf %34, %33 : vector<8x1xf32>
    %36 = vector.broadcast %3 : vector<1x1xf32> to vector<8x1xf32>
    %37 = arith.addf %35, %36 : vector<8x1xf32>
    %cst_18 = arith.constant 0.000000e+00 : f32
    %38 = vector.broadcast %cst_18 : f32 to vector<8x2xf32>
    %39 = tpu.concatenate %30, %37, %27, %38 in 1 : vector<8x4xf32>, vector<8x1xf32>, vector<8x1xf32>, vector<8x2xf32> -> vector<8x8xf32>
    %c0_19 = arith.constant 0 : index
    %c0_20 = arith.constant 0 : index
    %40 = vector.load %arg4[%c0_19, %c0_20] : memref<8x8xf32, #tpu.memory_space<vmem>>, vector<8x8xf32>
    tpu.vector_store %arg4[%c0_19, %c0_20], %39 {strides = array<i32>} : memref<8x8xf32, #tpu.memory_space<vmem>>, vector<8x8xf32>,
    return
  }
  func.func @transform_0(%arg0: i32) -> (i32, i32) {
    %c0_i32 = arith.constant 0 : i32
    %c0_i32_0 = arith.constant 0 : i32
    return %arg0, %c0_i32 : i32, i32
  }
  func.func @transform_1(%arg0: i32) -> (i32, i32) {
    %c0_i32 = arith.constant 0 : i32
    %c0_i32_0 = arith.constant 0 : i32
    %c0_i32_1 = arith.constant 0 : i32
    return %c0_i32, %c0_i32_0 : i32, i32
  }
  func.func @transform_2(%arg0: i32) -> (i32, i32) {
    %c0_i32 = arith.constant 0 : i32
    %c0_i32_0 = arith.constant 0 : i32
    %c0_i32_1 = arith.constant 0 : i32
    return %c0_i32, %c0_i32_0 : i32, i32
  }
  func.func @transform_3(%arg0: i32) -> (i32, i32) {
    %c0_i32 = arith.constant 0 : i32
    %c0_i32_0 = arith.constant 0 : i32
    return %arg0, %c0_i32 : i32, i32
  }
}

</mosaic_0001>

<bundles_post_ra>
// kernel: tpu_custom_call.1
= control target key start
LH: loop header
LB: loop body
LE: loop exit
PB: predicated region body
PF: predicated region fallthrough
CT: control target
= control target key end

     0   :  { %8 = vsyncpa [#allocation3], 0  ;;  %s551_s0 = inlined_call_operand.hbm [shape: f32[8,32], index: 0, kind: input, shape index: {}]   ;;  %s552_s1 = inlined_call_operand.hbm [shape: f32[8,128], index: 1, kind: input, shape index: {}]   ;;  %s553_s2 = inlined_call_operand.hbm [shape: bf16[272,128], index: 2, kind: input, shape index: {}]   ;;  %s554_s3 = inlined_call_operand.hbm [shape: f32[8,8], index: 3, kind: output, shape index: {}]  }
   0x1   :  { %9 = vsyncpa [#allocation6], 0  ;;  %s27_s14 = sshll.u32 %s552_s1, 4  ;;  %s28_s14 = int_to_ptr.hbm [resolvable:$true] %s27_s14 }
   0x2   :  { %10 = vsyncpa [#allocation4], 0  ;;  %s508_s15 = smov [#allocation5]   ;;  %s16_s19 = sshll.u32 %s551_s0, 4  ;;  %s17_s19 = int_to_ptr.hbm [resolvable:$true] %s16_s19 }
   0x3   :  { %s29_s16 = sshll.u32 %s508_s15, 4  ;;  %s509_s20 = smov [#allocation2]   ;;  %s30_s16 = int_to_ptr.vmem [resolvable:$true] %s29_s16 }
   0x4   :  { %32 = dma.hbm_to_vmem [thread:$0]  %s28_s14, 128, %s30_s16, [#allocation6]  }
   0x5   :  { %s18_s21 = sshll.u32 %s509_s20, 4  ;;  %s37_s24 = sshll.u32 %s553_s2, 4  ;;  %s19_s21 = int_to_ptr.vmem [resolvable:$true] %s18_s21  ;;  %s38_s24 = int_to_ptr.hbm [resolvable:$true] %s37_s24 }
   0x6   :  { %21 = dma.hbm_to_vmem [thread:$0]  %s17_s19, 128, %s19_s21, [#allocation3]  }
   0x7   :  { %s510_s1 = smov [#allocation7]   ;;  %s511_s26 = smov 64  }
   0x8   :  { %s39_s25 = sshll.u32 %s510_s1, 4  ;;  %s512_s27 = smov 4   ;;  %s40_s25 = int_to_ptr.vmem [resolvable:$true] %s39_s25 }
   0x9   :  { %45 = dma.hbm_to_vmem [thread:$0]  %s38_s24, 2176, %s40_s25, [#allocation6], %s511_s26, %s511_s26, %s512_s27  }
   0xa   :  { %502 = dma.done.wait [#allocation3], 128  }
   0xb   :  { %503 = vsyncadd [#allocation3], 4294967168 }
   0xc   :  { %504 = dma.done.wait [#allocation6], 2304  }
   0xd   :  { %505 = vsyncadd [#allocation6], 4294964992  ;;  %v372_v0 = vld [vmem:[#allocation7] sm:$0xff]  ;;  %v59_v1 = vld [vmem:[#allocation2] sm:$0xff]  ;;  %s513_s0 = smov 112   ;;  %vm106_vm0 = vcmask 130048  }
   0xe   :  { %v380_v2 = vld [vmem:[#allocation7 + $0x40] sm:$0xff]  ;;  %v98_v3 = vpack.c.bf16 %v59_v1, %v59_v1  ;;  %v259_v4 = vmul.f32 %v59_v1, %v59_v1  ;;  %254 = vrot.lane.b32.xlu1 %v59_v1, %s513_s0  ;;  %117 = vmatpush.bf16.msra.mxu0 %v372_v0  ;;  %v379_v5 = vld [vmem:[#allocation7 + $0x38] sm:$0xff]  ;;  %v378_v6 = vld [vmem:[#allocation7 + $0x30] sm:$0xff]  ;;  %vm264_vm1 = vcmask 31744   ;;  %s514_s2 = smov 124   ;;  %s515_s28 = smov 1  }
   0xf   :  { %174 = vmatpush.bf16.msra.mxu1 %v380_v2  ;;  %v377_v7 = vld [vmem:[#allocation7 + $0x28] sm:$0xff]  ;;  %v376_v8 = vld [vmem:[#allocation7 + $0x20] sm:$0xff]  ;;  %v375_v9 = vld [vmem:[#allocation7 + $0x18] sm:$0xff]  ;;  %vm279_vm2 = vcmask 39936   ;;  %s516_s29 = smov [#allocation8]   ;;  %s292_s6 = sshll.u32 %s554_s3, 4  ;;  %s293_s6 = int_to_ptr.hbm [resolvable:$true] %s292_s6 }
  0x10   :  { %261 = vrot.lane.b32.xlu0 %v259_v4, %s513_s0  ;;  %v374_v10 = vld [vmem:[#allocation7 + $0x10] sm:$0xff]  ;;  %v373_v11 = vld [vmem:[#allocation7 + $0x8] sm:$0xff]  ;;  %v388_v12 = vld [vmem:[#allocation7 + $0x80] sm:$0xff]  ;;  %s290_s30 = sshll.u32 %s516_s29, 4  ;;  %vm281_vm3 = vcmask 48128   ;;  %vm283_vm4 = vcmask 64512   ;;  %s291_s30 = int_to_ptr.vmem [resolvable:$true] %s290_s30 }
  0x11   :  { %307 = vmatmul.msk.bf16.vlgmr.msra.gmra.mxu0 %vm106_vm0, %v98_v3  ;;  %238 = vmatpush.bf16.msra.mxu2 %v388_v12  ;;  %v387_v13 = vld [vmem:[#allocation7 + $0x78] sm:$0xff]  ;;  %v386_v14 = vld [vmem:[#allocation7 + $0x70] sm:$0xff]  ;;  %v385_v17 = vld [vmem:[#allocation7 + $0x68] sm:$0xff] }
  0x12   :  { %v384_v18 = vld [vmem:[#allocation7 + $0x60] sm:$0xff]  ;;  %v398_v19 = vld [vmem:[#allocation5 + $0x1] ss:$0 sm:$0xff]  ;;  %v382_v26 = vld [vmem:[#allocation7 + $0x50] sm:$0xff] }
  0x13   :  { %175 = vmatpush.bf16.msra.mxu1 %v379_v5  ;;  %v383_v25 = vld [vmem:[#allocation7 + $0x58] sm:$0xff]  ;;  %v381_v27 = vld [vmem:[#allocation7 + $0x48] sm:$0xff] }
  0x14   :  { %v400_v28 = vld [vmem:[#allocation5] ss:$0 sm:$0xff]  ;;  %v399_v32 = vld [vmem:[#allocation5 + $0x2] ss:$0 sm:$0xff]  ;;  %v401_v38 = vld [vmem:[#allocation5 + $0x3] ss:$0 sm:$0xff] }
  0x15   :  { %239 = vmatpush.bf16.msra.mxu2 %v387_v13 }
  0x17   :  { %176 = vmatpush.bf16.msra.mxu1 %v378_v6 }
  0x19   :  { %240 = vmatpush.bf16.msra.mxu2 %v386_v14 }
  0x1b   :  { %177 = vmatpush.bf16.msra.mxu1 %v377_v7 }
  0x1d   :  { %241 = vmatpush.bf16.msra.mxu2 %v385_v17 }
  0x1f   :  { %178 = vmatpush.bf16.msra.mxu1 %v376_v8 }
  0x21   :  { %242 = vmatpush.bf16.msra.mxu2 %v384_v18 }
  0x23   :  { %179 = vmatpush.bf16.msra.mxu1 %v375_v9 }
  0x25   :  { %243 = vmatpush.bf16.msra.mxu2 %v383_v25 }
  0x27   :  { %180 = vmatpush.bf16.msra.mxu1 %v374_v10 }
  0x29   :  { %244 = vmatpush.bf16.msra.mxu2 %v382_v26 }
  0x2b   :  { %181 = vmatpush.bf16.msra.mxu1 %v373_v11 }
  0x2d   :  { %245 = vmatpush.bf16.msra.mxu2 %v381_v27 }
  0x80   :  { %v255_v39 = vpop.permute.xlu1 %254 }
  0x81   :  { %v257_v41 = vmul.f32 %v400_v28, %v255_v39 }
  0x82   :  { %v262_v15 = vpop.permute.xlu0 %261 }
  0x83   :  { %v265_v16 = vsel %vm264_vm1, %v262_v15, 0.0 }
  0x84   :  { %266 = vadd.xlane.f32.xlu0 %v265_v16 }
  0x8e   :  { %v119_v20 = vpop.f32.mrf.mxu0 }
  0x8f   :  { %v120_v21 = vadd.f32 %v398_v19, %v119_v20 }
  0x91   :  { %402 = vtanh.f32 %v120_v21 }
  0x96   :  { %v121_v22 = vpop.f32.mrf.mxu0 }
  0x97   :  { %v403_v23 = vpop.eup %402 }
  0x98   :  { %v124_v24 = vpack.c.bf16 %v403_v23, %v403_v23 }
  0x9a   :  { %182 = vmatmul.bf16.vlgmr.msra.gmra.mxu1 %v124_v24 }
  0xf7   :  { %v267_v29 = vpop.xlane.xlu0 %266 }
  0xf8   :  { %v268_v30 = vmul.f32 -0.5, %v267_v29 }
  0xfa   :  { %v269_v31 = vadd.f32 %v400_v28, %v268_v30 }
  0xfc   :  { %271 = vrot.lane.b32.xlu1 %v269_v31, %s514_s2 }
 0x117   :  { %v183_v33 = vpop.f32.mrf.mxu1 }
 0x118   :  { %v184_v34 = vadd.f32 %v399_v32, %v183_v33 }
 0x11a   :  { %404 = vtanh.f32 %v184_v34 }
 0x11f   :  { %v185_v35 = vpop.f32.mrf.mxu1 }
 0x120   :  { %v405_v36 = vpop.eup %404 }
 0x121   :  { %v188_v37 = vpack.c.bf16 %v405_v36, %v405_v36 }
 0x123   :  { %246 = vmatmul.bf16.vlgmr.msra.gmra.mxu2 %v188_v37 }
 0x16e   :  { %v272_v46 = vpop.permute.xlu1 %271 }
 0x1a6   :  { %v247_v40 = vpop.f32.mrf.mxu2 }
 0x1a7   :  { %v248_v42 = vadd.f32 %v401_v38, %v247_v40 }
 0x1a9   :  { %v251_v43 = vmax.f32 %v248_v42, 0.0  ;;  %275 = vrot.lane.b32.xlu2 %v248_v42, %s515_s28 }
 0x1ab   :  { %v258_v44 = vadd.f32 %v257_v41, %v251_v43 }
 0x1ad   :  { %v278_v47 = vsel %vm264_vm1, %v258_v44, %v272_v46 }
 0x1ae   :  { %v249_v45 = vpop.f32.mrf.mxu2 }
 0x203   :  { %v276_v48 = vpop.permute.xlu2 %275 }
 0x204   :  { %v280_v49 = vsel %vm279_vm2, %v278_v47, %v276_v48 }
 0x205   :  { %v282_v50 = vsel %vm281_vm3, %v280_v49, 0.0 }
 0x206   :  { %284 = vst.msk [vmem:[#allocation8] sm:$0xff] %vm283_vm4, %v282_v50 }
 0x207   :  { %295 = dma.vmem_to_hbm [thread:$0]  %s291_s30, 128, %s293_s6, [#allocation4]  }
 0x208   :  { %506 = dma.done.wait [#allocation4], 128  }
 0x209   :  { %507 = vsyncadd [#allocation4], 4294967168 }
 0x20a   :  { %300 = vsyncpa [#allocation3], 1 }
 0x20b   :  { %301 = vsyncpa [#allocation6], 1 }
 0x20c   :  { %302 = vsyncpa [#allocation4], 1 }

</bundles_post_ra>
